<compile_context>
chip_gen: v7x
topology: tpu7x:2x2x1
jax: 0.10.0
libtpu: 0.0.40
codegen_flags: <defaults>
</compile_context>

<pallas_src>
import math

import jax
import jax.numpy as jnp
from jax.experimental import pallas as pl
from jax.experimental.pallas import tpu as pltpu

HIDDEN = 32
HID2 = 2 * HIDDEN                     # both branches side by side
EMB = 32
N_RESBLOCKS = 3
STATUS_LEN = 4
N_POS = 14
N_DIST = 5
N_AGENTS = 5
INPUT_DIM = 8 + N_AGENTS * EMB        # 168 (original concatenated vector)
N_ACC = 2
N_TURN = 21
OUT_W = HID2                          # 64 output lanes (0:2 acc, 2:23 turn)

# Row offsets inside the packed bf16 weight slab (all multiples of 16 so bf16
# sublane-packed slices start tile-aligned).
R_S = 0                               # status rows        (4 used of 16)
R_P = 16                              # positions rows     (14 used of 16)
R_D = 32                              # distances rows     (5 used of 16)
R_RES = 48                            # 6 x (64,64) resblock matrices
R_O = R_RES + 2 * N_RESBLOCKS * HID2  # 432: fused output projection (64,64)
W64_ROWS = R_O + HID2                 # 496 total rows


# ----------------------------------------------------------------------------
# The single fused kernel (gridless, everything resident in VMEM).
# ----------------------------------------------------------------------------
def _brain_kernel(status_ref, positions_ref, distances_ref,
                  w64_ref, bias_ref, out_ref):
    f32 = jnp.float32
    bf16 = jnp.bfloat16

    def dot(x, w):  # bf16 MXU matmul, f32 accumulate
        return jnp.dot(x.astype(bf16), w, preferred_element_type=f32)

    # --- First Linear layer of BOTH branches, with the agent embeddings
    #     pre-multiplied into the weights and the input "gather" expressed as
    #     a weight-row permutation:  h = status@Ws + positions@Wp + dist@Wd.
    h = (dot(status_ref[...],    w64_ref[R_S:R_S + STATUS_LEN, :])
         + dot(positions_ref[...], w64_ref[R_P:R_P + N_POS, :])
         + dot(distances_ref[...], w64_ref[R_D:R_D + N_DIST, :])
         + bias_ref[0:1, :])                                      # (1, 64)

    # --- 3 ResidualBlocks, both branches at once via block-diagonal weights.
    for i in range(N_RESBLOCKS):
        wa = w64_ref[R_RES + (2 * i) * HID2:R_RES + (2 * i + 1) * HID2, :]
        wb = w64_ref[R_RES + (2 * i + 1) * HID2:R_RES + (2 * i + 2) * HID2, :]
        res = h
        m = dot(h, wa) + bias_ref[1 + i:2 + i, :]
        m = jnp.where(m >= 0.0, m, 0.01 * m)                      # LeakyReLU
        m = dot(m, wb) + bias_ref[4 + i:5 + i, :]
        s = m + res
        # tanh(softplus(s)) == (u^2 + 2u) / (u^2 + 2u + 2), u = exp(s)
        u = jnp.exp(jnp.minimum(s, 30.0))
        q = u * (u + 2.0)
        h = q / (q + 2.0)

    # --- Fused output projection: acc logits in lanes 0:2, turn in 2:23.
    y = dot(h, w64_ref[R_O:R_O + HID2, :]) + bias_ref[7:8, :]     # (1, 64)

    lane = jax.lax.broadcasted_iota(jnp.int32, y.shape, 1)
    acc_mask = lane < N_ACC
    turn_mask = jnp.logical_and(lane >= N_ACC, lane < N_ACC + N_TURN)

    def masked_softmax(mask):
        z = jnp.where(mask, y, -1e30)
        z = z - jnp.max(z, axis=-1, keepdims=True)
        e = jnp.where(mask, jnp.exp(z), 0.0)
        denom = jnp.sum(e, axis=-1, keepdims=True)
        return e * pl.reciprocal(denom, approx=True)

    p_acc = jnp.clip(masked_softmax(acc_mask), 0.01, 0.999)
    p_turn = jnp.clip(masked_softmax(turn_mask), 0.01, 0.98)
    out_ref[...] = jnp.where(acc_mask, p_acc,
                             jnp.where(turn_mask, p_turn, 0.0))


def _vmem_spec():
    return pl.BlockSpec(memory_space=pltpu.MemorySpace.VMEM)


# ----------------------------------------------------------------------------
# Parameter construction (matches the shapes / init of the PyTorch __init__).
# ----------------------------------------------------------------------------
def init_linear(key, fan_in, fan_out):
    k1, k2 = jax.random.split(key)
    bound = 1.0 / math.sqrt(fan_in)
    w = jax.random.uniform(k1, (fan_in, fan_out), jnp.float32, -bound, bound)
    b = jax.random.uniform(k2, (1, fan_out), jnp.float32, -bound, bound)
    return w, b


def init_branch(key, input_dim, hidden_dim, out_dim):
    keys = jax.random.split(key, 2 + 2 * N_RESBLOCKS)
    w0, b0 = init_linear(keys[0], input_dim, hidden_dim)
    was, bas, wbs, bbs = [], [], [], []
    for i in range(N_RESBLOCKS):
        wa, ba = init_linear(keys[1 + 2 * i], hidden_dim, hidden_dim)
        wb, bb = init_linear(keys[2 + 2 * i], hidden_dim, hidden_dim)
        was.append(wa); bas.append(ba); wbs.append(wb); bbs.append(bb)
    wo, bo = init_linear(keys[-1], hidden_dim, out_dim)
    return (w0, b0, jnp.stack(was), jnp.stack(bas),
            jnp.stack(wbs), jnp.stack(bbs), wo, bo)


def init_brain(key):
    k_acc, k_turn, k_team, k_enemy = jax.random.split(key, 4)
    bound = 1.0 / math.sqrt(EMB)
    return {
        "acc": init_branch(k_acc, INPUT_DIM, HIDDEN, N_ACC),
        "turn": init_branch(k_turn, INPUT_DIM, HIDDEN, N_TURN),
        "team_emb": jax.random.uniform(k_team, (3, EMB), jnp.float32, -bound, bound),
        "enemy_emb": jax.random.uniform(k_enemy, (3, EMB), jnp.float32, -bound, bound),
    }


def pack_brain_params(params):
    """One-time repack of the original-layout params into the fused layout."""
    w0a, b0a, waa, baa, wba, bba, woa, boa = params["acc"]
    w0t, b0t, wat, bat, wbt, bbt, wot, bot = params["turn"]

    # Both branches side by side in the first layer.
    w0_both = jnp.concatenate([w0a, w0t], axis=1)                 # (168, 64)
    b0 = jnp.concatenate([b0a, b0t], axis=1)                      # (1, 64)

    # Fold the embedding matmuls into the first layer and permute rows so the
    # kernel can consume status / positions / distances directly.
    ws = w0_both[0:STATUS_LEN]                                    # (4, 64)
    wp_rows = [w0_both[STATUS_LEN:8]]                             # positions[0:4]
    wd_rows = []
    for i in range(N_AGENTS):
        e = params["team_emb"] if i < 2 else params["enemy_emb"]  # (3, 32)
        mi = e @ w0_both[8 + EMB * i: 8 + EMB * (i + 1)]          # (3, 64)
        wp_rows.append(mi[0:2])                                   # positions[4+2i:6+2i]
        wd_rows.append(mi[2:3])                                   # distances[i]
    wp = jnp.concatenate(wp_rows, axis=0)                         # (14, 64)
    wd = jnp.concatenate(wd_rows, axis=0)                         # (5, 64)

    # Residual blocks: block-diagonal so one matmul serves both branches.
    def blockdiag(a, t):
        z = jnp.zeros((N_RESBLOCKS, HIDDEN, HIDDEN), jnp.float32)
        top = jnp.concatenate([a, z], axis=2)
        bot = jnp.concatenate([z, t], axis=2)
        return jnp.concatenate([top, bot], axis=1)                # (3, 64, 64)

    wa = blockdiag(waa, wat)
    wb = blockdiag(wba, wbt)
    ba = jnp.concatenate([baa, bat], axis=2)                      # (3, 1, 64)
    bb = jnp.concatenate([bba, bbt], axis=2)                      # (3, 1, 64)

    # Fused output projection -> lane-dense (1, 64) output slab.
    wo = jnp.zeros((HID2, OUT_W), jnp.float32)
    wo = wo.at[0:HIDDEN, 0:N_ACC].set(woa)
    wo = wo.at[HIDDEN:HID2, N_ACC:N_ACC + N_TURN].set(wot)
    bo = jnp.zeros((1, OUT_W), jnp.float32)
    bo = bo.at[0, 0:N_ACC].set(boa[0])
    bo = bo.at[0, N_ACC:N_ACC + N_TURN].set(bot[0])

    # --- Single bf16 weight slab (all matmul operands). ---
    w64 = jnp.zeros((W64_ROWS, HID2), jnp.float32)
    w64 = w64.at[R_S:R_S + STATUS_LEN].set(ws)
    w64 = w64.at[R_P:R_P + N_POS].set(wp)
    w64 = w64.at[R_D:R_D + N_DIST].set(wd)
    for i in range(N_RESBLOCKS):
        w64 = w64.at[R_RES + (2 * i) * HID2:R_RES + (2 * i + 1) * HID2].set(wa[i])
        w64 = w64.at[R_RES + (2 * i + 1) * HID2:R_RES + (2 * i + 2) * HID2].set(wb[i])
    w64 = w64.at[R_O:R_O + HID2].set(wo)
    w64 = w64.astype(jnp.bfloat16)

    # --- Single f32 bias slab: row0=b0, rows1..3=ba, rows4..6=bb, row7=bo. ---
    bias = jnp.zeros((8, OUT_W), jnp.float32)
    bias = bias.at[0].set(b0[0])
    for i in range(N_RESBLOCKS):
        bias = bias.at[1 + i].set(ba[i, 0])
        bias = bias.at[4 + i].set(bb[i, 0])
    bias = bias.at[7].set(bo[0])

    return {"w64": w64, "bias": bias}


# ----------------------------------------------------------------------------
# Forward pass: zero concatenation in the wrapper, one fused pallas_call.
# ----------------------------------------------------------------------------
@jax.jit
def brain_forward(packed, status, distances, positions):
    status = status.astype(jnp.float32).reshape(1, STATUS_LEN)
    positions = positions.astype(jnp.float32).reshape(1, N_POS)
    distances = distances.astype(jnp.float32).reshape(1, N_DIST)

    out = pl.pallas_call(
        _brain_kernel,
        in_specs=[_vmem_spec()] * 5,
        out_specs=_vmem_spec(),
        out_shape=jax.ShapeDtypeStruct((1, OUT_W), jnp.float32),
    )(status, positions, distances, packed["w64"], packed["bias"])

    accelerate = out[0, 0:N_ACC]                          # (2,)
    turn = out[0, N_ACC:N_ACC + N_TURN]                   # (21,)
    return accelerate, turn


# ----------------------------------------------------------------------------
# Pure-JAX reference (mirrors the original PyTorch structure) for checking.
# ----------------------------------------------------------------------------
def _reference_forward(params, status, distances, positions):
    team, enemy = params["team_emb"], params["enemy_emb"]
    embs = [
        jnp.concatenate([positions[4:6], distances[0:1]]) @ team,
        jnp.concatenate([positions[6:8], distances[1:2]]) @ team,
        jnp.concatenate([positions[8:10], distances[2:3]]) @ enemy,
        jnp.concatenate([positions[10:12], distances[3:4]]) @ enemy,
        jnp.concatenate([positions[12:14], distances[4:5]]) @ enemy,
    ]
    vec = jnp.concatenate([status, positions[0:2], positions[2:4]] + embs)

    def branch(p, x):
        w0, b0, wa, ba, wb, bb, wo, bo = p
        h = x @ w0 + b0[0]
        for i in range(N_RESBLOCKS):
            m = h @ wa[i] + ba[i, 0]
            m = jnp.where(m >= 0.0, m, 0.01 * m)
            m = m @ wb[i] + bb[i, 0]
            s = m + h
            h = jnp.tanh(jnp.where(s > 20.0, s,
                                   jnp.log1p(jnp.exp(jnp.minimum(s, 20.0)))))
        return jax.nn.softmax(h @ wo + bo[0])

    acc = jnp.clip(branch(params["acc"], vec), 0.01, 0.999)
    turn = jnp.clip(branch(params["turn"], vec), 0.01, 0.98)
    return acc, turn


if __name__ == "__main__":
    key = jax.random.PRNGKey(0)
    k_params, k_s, k_d, k_p = jax.random.split(key, 4)
    params = init_brain(k_params)
    packed = pack_brain_params(params)

    status = jax.random.uniform(k_s, (STATUS_LEN,), jnp.float32)
    distances = jax.random.uniform(k_d, (N_DIST,), jnp.float32)
    positions = jax.random.uniform(k_p, (N_POS,), jnp.float32, -1.0, 1.0)

    accelerate, turn = brain_forward(packed, status, distances, positions)
    jax.block_until_ready((accelerate, turn))

    assert accelerate.shape == (N_ACC,) and turn.shape == (N_TURN,)
    assert bool(jnp.all(accelerate >= 0.01)) and bool(jnp.all(accelerate <= 0.999))
    assert bool(jnp.all(turn >= 0.01)) and bool(jnp.all(turn <= 0.98))

    acc_ref, turn_ref = _reference_forward(params, status, distances, positions)
    assert bool(jnp.allclose(accelerate, acc_ref, atol=5e-3))
    assert bool(jnp.allclose(turn, turn_ref, atol=5e-3))

    print("KERNEL_OK")
</pallas_src>

<mosaic_0001>
module attributes {stable_mosaic.version = 11 : i64} {
  func.func @_brain_kernel(%arg0: memref<1x4xf32, #tpu.memory_space<vmem>>, %arg1: memref<1x14xf32, #tpu.memory_space<vmem>>, %arg2: memref<1x5xf32, #tpu.memory_space<vmem>>, %arg3: memref<496x64xbf16, #tpu.memory_space<vmem>>, %arg4: memref<8x64xf32, #tpu.memory_space<vmem>>, %arg5: memref<1x64xf32, #tpu.memory_space<vmem>>) attributes {dimension_semantics = [], scalar_prefetch = 0 : i64, scratch_operands = 0 : i64, tpu.core_type = #tpu.core_type<tc>} {
    %c0 = arith.constant 0 : index
    %c0_0 = arith.constant 0 : index
    %0 = vector.load %arg0[%c0, %c0_0] : memref<1x4xf32, #tpu.memory_space<vmem>>, vector<1x4xf32>
    %c0_1 = arith.constant 0 : index
    %c0_2 = arith.constant 0 : index
    %1 = vector.load %arg3[%c0_1, %c0_2] : memref<496x64xbf16, #tpu.memory_space<vmem>>, vector<4x64xbf16>
    %2 = arith.truncf %0 : vector<1x4xf32> to vector<1x4xbf16>
    %cst = arith.constant dense<0.000000e+00> : vector<1x64xf32>
    %3 = tpu.matmul %2, %1, %cst {dimension_numbers = #tpu.dot_dimension_numbers<[1], [0], [0], [1], [0, 0, 1, 1], [], []>} : vector<1x4xbf16>, vector<4x64xbf16>, vector<1x64xf32> -> vector<1x64xf32>
    %c0_3 = arith.constant 0 : index
    %c0_4 = arith.constant 0 : index
    %4 = vector.load %arg1[%c0_3, %c0_4] : memref<1x14xf32, #tpu.memory_space<vmem>>, vector<1x14xf32>
    %c16 = arith.constant 16 : index
    %c0_5 = arith.constant 0 : index
    %5 = vector.load %arg3[%c16, %c0_5] : memref<496x64xbf16, #tpu.memory_space<vmem>>, vector<14x64xbf16>
    %6 = arith.truncf %4 : vector<1x14xf32> to vector<1x14xbf16>
    %cst_6 = arith.constant dense<0.000000e+00> : vector<1x64xf32>
    %7 = tpu.matmul %6, %5, %cst_6 {dimension_numbers = #tpu.dot_dimension_numbers<[1], [0], [0], [1], [0, 0, 1, 1], [], []>} : vector<1x14xbf16>, vector<14x64xbf16>, vector<1x64xf32> -> vector<1x64xf32>
    %8 = arith.addf %3, %7 : vector<1x64xf32>
    %c0_7 = arith.constant 0 : index
    %c0_8 = arith.constant 0 : index
    %9 = vector.load %arg2[%c0_7, %c0_8] : memref<1x5xf32, #tpu.memory_space<vmem>>, vector<1x5xf32>
    %c32 = arith.constant 32 : index
    %c0_9 = arith.constant 0 : index
    %10 = vector.load %arg3[%c32, %c0_9] : memref<496x64xbf16, #tpu.memory_space<vmem>>, vector<5x64xbf16>
    %11 = arith.truncf %9 : vector<1x5xf32> to vector<1x5xbf16>
    %cst_10 = arith.constant dense<0.000000e+00> : vector<1x64xf32>
    %12 = tpu.matmul %11, %10, %cst_10 {dimension_numbers = #tpu.dot_dimension_numbers<[1], [0], [0], [1], [0, 0, 1, 1], [], []>} : vector<1x5xbf16>, vector<5x64xbf16>, vector<1x64xf32> -> vector<1x64xf32>
    %13 = arith.addf %8, %12 : vector<1x64xf32>
    %c0_11 = arith.constant 0 : index
    %c0_12 = arith.constant 0 : index
    %14 = vector.load %arg4[%c0_11, %c0_12] : memref<8x64xf32, #tpu.memory_space<vmem>>, vector<1x64xf32>
    %15 = arith.addf %13, %14 : vector<1x64xf32>
    %c48 = arith.constant 48 : index
    %c0_13 = arith.constant 0 : index
    %16 = vector.load %arg3[%c48, %c0_13] : memref<496x64xbf16, #tpu.memory_space<vmem>>, vector<64x64xbf16>
    %c112 = arith.constant 112 : index
    %c0_14 = arith.constant 0 : index
    %17 = vector.load %arg3[%c112, %c0_14] : memref<496x64xbf16, #tpu.memory_space<vmem>>, vector<64x64xbf16>
    %18 = arith.truncf %15 : vector<1x64xf32> to vector<1x64xbf16>
    %cst_15 = arith.constant dense<0.000000e+00> : vector<1x64xf32>
    %19 = tpu.matmul %18, %16, %cst_15 {dimension_numbers = #tpu.dot_dimension_numbers<[1], [0], [0], [1], [0, 0, 1, 1], [], []>} : vector<1x64xbf16>, vector<64x64xbf16>, vector<1x64xf32> -> vector<1x64xf32>
    %c1 = arith.constant 1 : index
    %c0_16 = arith.constant 0 : index
    %20 = vector.load %arg4[%c1, %c0_16] : memref<8x64xf32, #tpu.memory_space<vmem>>, vector<1x64xf32>
    %21 = arith.addf %19, %20 : vector<1x64xf32>
    %cst_17 = arith.constant 0.000000e+00 : f32
    %22 = vector.broadcast %cst_17 : f32 to vector<1x64xf32>
    %23 = arith.cmpf oge, %21, %22 : vector<1x64xf32>
    %cst_18 = arith.constant 0.00999999977 : f32
    %24 = vector.broadcast %cst_18 : f32 to vector<1x64xf32>
    %25 = arith.mulf %24, %21 : vector<1x64xf32>
    %26 = arith.select %23, %21, %25 : vector<1x64xi1>, vector<1x64xf32>
    %27 = arith.truncf %26 : vector<1x64xf32> to vector<1x64xbf16>
    %cst_19 = arith.constant dense<0.000000e+00> : vector<1x64xf32>
    %28 = tpu.matmul %27, %17, %cst_19 {dimension_numbers = #tpu.dot_dimension_numbers<[1], [0], [0], [1], [0, 0, 1, 1], [], []>} : vector<1x64xbf16>, vector<64x64xbf16>, vector<1x64xf32> -> vector<1x64xf32>
    %c4 = arith.constant 4 : index
    %c0_20 = arith.constant 0 : index
    %29 = vector.load %arg4[%c4, %c0_20] : memref<8x64xf32, #tpu.memory_space<vmem>>, vector<1x64xf32>
    %30 = arith.addf %28, %29 : vector<1x64xf32>
    %31 = arith.addf %30, %15 : vector<1x64xf32>
    %cst_21 = arith.constant 3.000000e+01 : f32
    %32 = vector.broadcast %cst_21 : f32 to vector<1x64xf32>
    %33 = arith.minimumf %31, %32 : vector<1x64xf32>
    %34 = math.exp %33 : vector<1x64xf32>
    %cst_22 = arith.constant 2.000000e+00 : f32
    %35 = vector.broadcast %cst_22 : f32 to vector<1x64xf32>
    %36 = arith.addf %34, %35 : vector<1x64xf32>
    %37 = arith.mulf %34, %36 : vector<1x64xf32>
    %cst_23 = arith.constant 2.000000e+00 : f32
    %38 = vector.broadcast %cst_23 : f32 to vector<1x64xf32>
    %39 = arith.addf %37, %38 : vector<1x64xf32>
    %40 = arith.divf %37, %39 : vector<1x64xf32>
    %c176 = arith.constant 176 : index
    %c0_24 = arith.constant 0 : index
    %41 = vector.load %arg3[%c176, %c0_24] : memref<496x64xbf16, #tpu.memory_space<vmem>>, vector<64x64xbf16>
    %c240 = arith.constant 240 : index
    %c0_25 = arith.constant 0 : index
    %42 = vector.load %arg3[%c240, %c0_25] : memref<496x64xbf16, #tpu.memory_space<vmem>>, vector<64x64xbf16>
    %43 = arith.truncf %40 : vector<1x64xf32> to vector<1x64xbf16>
    %cst_26 = arith.constant dense<0.000000e+00> : vector<1x64xf32>
    %44 = tpu.matmul %43, %41, %cst_26 {dimension_numbers = #tpu.dot_dimension_numbers<[1], [0], [0], [1], [0, 0, 1, 1], [], []>} : vector<1x64xbf16>, vector<64x64xbf16>, vector<1x64xf32> -> vector<1x64xf32>
    %c2 = arith.constant 2 : index
    %c0_27 = arith.constant 0 : index
    %45 = vector.load %arg4[%c2, %c0_27] : memref<8x64xf32, #tpu.memory_space<vmem>>, vector<1x64xf32>
    %46 = arith.addf %44, %45 : vector<1x64xf32>
    %cst_28 = arith.constant 0.000000e+00 : f32
    %47 = vector.broadcast %cst_28 : f32 to vector<1x64xf32>
    %48 = arith.cmpf oge, %46, %47 : vector<1x64xf32>
    %cst_29 = arith.constant 0.00999999977 : f32
    %49 = vector.broadcast %cst_29 : f32 to vector<1x64xf32>
    %50 = arith.mulf %49, %46 : vector<1x64xf32>
    %51 = arith.select %48, %46, %50 : vector<1x64xi1>, vector<1x64xf32>
    %52 = arith.truncf %51 : vector<1x64xf32> to vector<1x64xbf16>
    %cst_30 = arith.constant dense<0.000000e+00> : vector<1x64xf32>
    %53 = tpu.matmul %52, %42, %cst_30 {dimension_numbers = #tpu.dot_dimension_numbers<[1], [0], [0], [1], [0, 0, 1, 1], [], []>} : vector<1x64xbf16>, vector<64x64xbf16>, vector<1x64xf32> -> vector<1x64xf32>
    %c5 = arith.constant 5 : index
    %c0_31 = arith.constant 0 : index
    %54 = vector.load %arg4[%c5, %c0_31] : memref<8x64xf32, #tpu.memory_space<vmem>>, vector<1x64xf32>
    %55 = arith.addf %53, %54 : vector<1x64xf32>
    %56 = arith.addf %55, %40 : vector<1x64xf32>
    %cst_32 = arith.constant 3.000000e+01 : f32
    %57 = vector.broadcast %cst_32 : f32 to vector<1x64xf32>
    %58 = arith.minimumf %56, %57 : vector<1x64xf32>
    %59 = math.exp %58 : vector<1x64xf32>
    %cst_33 = arith.constant 2.000000e+00 : f32
    %60 = vector.broadcast %cst_33 : f32 to vector<1x64xf32>
    %61 = arith.addf %59, %60 : vector<1x64xf32>
    %62 = arith.mulf %59, %61 : vector<1x64xf32>
    %cst_34 = arith.constant 2.000000e+00 : f32
    %63 = vector.broadcast %cst_34 : f32 to vector<1x64xf32>
    %64 = arith.addf %62, %63 : vector<1x64xf32>
    %65 = arith.divf %62, %64 : vector<1x64xf32>
    %c304 = arith.constant 304 : index
    %c0_35 = arith.constant 0 : index
    %66 = vector.load %arg3[%c304, %c0_35] : memref<496x64xbf16, #tpu.memory_space<vmem>>, vector<64x64xbf16>
    %c368 = arith.constant 368 : index
    %c0_36 = arith.constant 0 : index
    %67 = vector.load %arg3[%c368, %c0_36] : memref<496x64xbf16, #tpu.memory_space<vmem>>, vector<64x64xbf16>
    %68 = arith.truncf %65 : vector<1x64xf32> to vector<1x64xbf16>
    %cst_37 = arith.constant dense<0.000000e+00> : vector<1x64xf32>
    %69 = tpu.matmul %68, %66, %cst_37 {dimension_numbers = #tpu.dot_dimension_numbers<[1], [0], [0], [1], [0, 0, 1, 1], [], []>} : vector<1x64xbf16>, vector<64x64xbf16>, vector<1x64xf32> -> vector<1x64xf32>
    %c3 = arith.constant 3 : index
    %c0_38 = arith.constant 0 : index
    %70 = vector.load %arg4[%c3, %c0_38] : memref<8x64xf32, #tpu.memory_space<vmem>>, vector<1x64xf32>
    %71 = arith.addf %69, %70 : vector<1x64xf32>
    %cst_39 = arith.constant 0.000000e+00 : f32
    %72 = vector.broadcast %cst_39 : f32 to vector<1x64xf32>
    %73 = arith.cmpf oge, %71, %72 : vector<1x64xf32>
    %cst_40 = arith.constant 0.00999999977 : f32
    %74 = vector.broadcast %cst_40 : f32 to vector<1x64xf32>
    %75 = arith.mulf %74, %71 : vector<1x64xf32>
    %76 = arith.select %73, %71, %75 : vector<1x64xi1>, vector<1x64xf32>
    %77 = arith.truncf %76 : vector<1x64xf32> to vector<1x64xbf16>
    %cst_41 = arith.constant dense<0.000000e+00> : vector<1x64xf32>
    %78 = tpu.matmul %77, %67, %cst_41 {dimension_numbers = #tpu.dot_dimension_numbers<[1], [0], [0], [1], [0, 0, 1, 1], [], []>} : vector<1x64xbf16>, vector<64x64xbf16>, vector<1x64xf32> -> vector<1x64xf32>
    %c6 = arith.constant 6 : index
    %c0_42 = arith.constant 0 : index
    %79 = vector.load %arg4[%c6, %c0_42] : memref<8x64xf32, #tpu.memory_space<vmem>>, vector<1x64xf32>
    %80 = arith.addf %78, %79 : vector<1x64xf32>
    %81 = arith.addf %80, %65 : vector<1x64xf32>
    %cst_43 = arith.constant 3.000000e+01 : f32
    %82 = vector.broadcast %cst_43 : f32 to vector<1x64xf32>
    %83 = arith.minimumf %81, %82 : vector<1x64xf32>
    %84 = math.exp %83 : vector<1x64xf32>
    %cst_44 = arith.constant 2.000000e+00 : f32
    %85 = vector.broadcast %cst_44 : f32 to vector<1x64xf32>
    %86 = arith.addf %84, %85 : vector<1x64xf32>
    %87 = arith.mulf %84, %86 : vector<1x64xf32>
    %cst_45 = arith.constant 2.000000e+00 : f32
    %88 = vector.broadcast %cst_45 : f32 to vector<1x64xf32>
    %89 = arith.addf %87, %88 : vector<1x64xf32>
    %90 = arith.divf %87, %89 : vector<1x64xf32>
    %c432 = arith.constant 432 : index
    %c0_46 = arith.constant 0 : index
    %91 = vector.load %arg3[%c432, %c0_46] : memref<496x64xbf16, #tpu.memory_space<vmem>>, vector<64x64xbf16>
    %92 = arith.truncf %90 : vector<1x64xf32> to vector<1x64xbf16>
    %cst_47 = arith.constant dense<0.000000e+00> : vector<1x64xf32>
    %93 = tpu.matmul %92, %91, %cst_47 {dimension_numbers = #tpu.dot_dimension_numbers<[1], [0], [0], [1], [0, 0, 1, 1], [], []>} : vector<1x64xbf16>, vector<64x64xbf16>, vector<1x64xf32> -> vector<1x64xf32>
    %c7 = arith.constant 7 : index
    %c0_48 = arith.constant 0 : index
    %94 = vector.load %arg4[%c7, %c0_48] : memref<8x64xf32, #tpu.memory_space<vmem>>, vector<1x64xf32>
    %95 = arith.addf %93, %94 : vector<1x64xf32>
    %96 = tpu.iota {dimensions = array<i32: 1>} : vector<1x64xi32>
    %c2_i32 = arith.constant 2 : i32
    %97 = vector.broadcast %c2_i32 : i32 to vector<1x64xi32>
    %98 = arith.cmpi slt, %96, %97 : vector<1x64xi32>
    %c2_i32_49 = arith.constant 2 : i32
    %99 = vector.broadcast %c2_i32_49 : i32 to vector<1x64xi32>
    %100 = arith.cmpi sge, %96, %99 : vector<1x64xi32>
    %c23_i32 = arith.constant 23 : i32
    %101 = vector.broadcast %c23_i32 : i32 to vector<1x64xi32>
    %102 = arith.cmpi slt, %96, %101 : vector<1x64xi32>
    %103 = arith.andi %100, %102 : vector<1x64xi1>
    %cst_50 = arith.constant -1.000000e+30 : f32
    %104 = vector.broadcast %cst_50 : f32 to vector<1x64xf32>
    %105 = arith.select %98, %95, %104 : vector<1x64xi1>, vector<1x64xf32>
    %cst_51 = arith.constant dense<0xFF800000> : vector<1xf32>
    %106 = vector.multi_reduction <maximumf>, %105, %cst_51 [1] : vector<1x64xf32> to vector<1xf32>
    %107 = vector.shape_cast %106 : vector<1xf32> to vector<1x1xf32>
    %108 = vector.broadcast %107 : vector<1x1xf32> to vector<1x64xf32>
    %109 = arith.subf %105, %108 : vector<1x64xf32>
    %110 = math.exp %109 : vector<1x64xf32>
    %cst_52 = arith.constant 0.000000e+00 : f32
    %111 = vector.broadcast %cst_52 : f32 to vector<1x64xf32>
    %112 = arith.select %98, %110, %111 : vector<1x64xi1>, vector<1x64xf32>
    %cst_53 = arith.constant dense<0.000000e+00> : vector<1xf32>
    %113 = vector.multi_reduction <add>, %112, %cst_53 [1] : vector<1x64xf32> to vector<1xf32>
    %114 = vector.shape_cast %113 : vector<1xf32> to vector<1x1xf32>
    %115 = tpu.reciprocal %114 {approx = true} : vector<1x1xf32> -> vector<1x1xf32>
    %116 = vector.broadcast %115 : vector<1x1xf32> to vector<1x64xf32>
    %117 = arith.mulf %112, %116 : vector<1x64xf32>
    %cst_54 = arith.constant 0.00999999977 : f32
    %cst_55 = arith.constant 9.990000e-01 : f32
    %118 = vector.broadcast %cst_54 : f32 to vector<1x64xf32>
    %119 = arith.maximumf %118, %117 : vector<1x64xf32>
    %120 = vector.broadcast %cst_55 : f32 to vector<1x64xf32>
    %121 = arith.minimumf %120, %119 : vector<1x64xf32>
    %cst_56 = arith.constant -1.000000e+30 : f32
    %122 = vector.broadcast %cst_56 : f32 to vector<1x64xf32>
    %123 = arith.select %103, %95, %122 : vector<1x64xi1>, vector<1x64xf32>
    %cst_57 = arith.constant dense<0xFF800000> : vector<1xf32>
    %124 = vector.multi_reduction <maximumf>, %123, %cst_57 [1] : vector<1x64xf32> to vector<1xf32>
    %125 = vector.shape_cast %124 : vector<1xf32> to vector<1x1xf32>
    %126 = vector.broadcast %125 : vector<1x1xf32> to vector<1x64xf32>
    %127 = arith.subf %123, %126 : vector<1x64xf32>
    %128 = math.exp %127 : vector<1x64xf32>
    %cst_58 = arith.constant 0.000000e+00 : f32
    %129 = vector.broadcast %cst_58 : f32 to vector<1x64xf32>
    %130 = arith.select %103, %128, %129 : vector<1x64xi1>, vector<1x64xf32>
    %cst_59 = arith.constant dense<0.000000e+00> : vector<1xf32>
    %131 = vector.multi_reduction <add>, %130, %cst_59 [1] : vector<1x64xf32> to vector<1xf32>
    %132 = vector.shape_cast %131 : vector<1xf32> to vector<1x1xf32>
    %133 = tpu.reciprocal %132 {approx = true} : vector<1x1xf32> -> vector<1x1xf32>
    %134 = vector.broadcast %133 : vector<1x1xf32> to vector<1x64xf32>
    %135 = arith.mulf %130, %134 : vector<1x64xf32>
    %cst_60 = arith.constant 0.00999999977 : f32
    %cst_61 = arith.constant 9.800000e-01 : f32
    %136 = vector.broadcast %cst_60 : f32 to vector<1x64xf32>
    %137 = arith.maximumf %136, %135 : vector<1x64xf32>
    %138 = vector.broadcast %cst_61 : f32 to vector<1x64xf32>
    %139 = arith.minimumf %138, %137 : vector<1x64xf32>
    %cst_62 = arith.constant 0.000000e+00 : f32
    %140 = vector.broadcast %cst_62 : f32 to vector<1x64xf32>
    %141 = arith.select %103, %139, %140 : vector<1x64xi1>, vector<1x64xf32>
    %142 = arith.select %98, %121, %141 : vector<1x64xi1>, vector<1x64xf32>
    %c0_63 = arith.constant 0 : index
    %c0_64 = arith.constant 0 : index
    %143 = vector.load %arg5[%c0_63, %c0_64] : memref<1x64xf32, #tpu.memory_space<vmem>>, vector<1x64xf32>
    tpu.vector_store %arg5[%c0_63, %c0_64], %142 {strides = array<i32>} : memref<1x64xf32, #tpu.memory_space<vmem>>, vector<1x64xf32>,
    return
  }
}

</mosaic_0001>

<bundles_post_ra>
// kernel: brain_forward.1
= control target key start
LH: loop header
LB: loop body
LE: loop exit
PB: predicated region body
PF: predicated region fallthrough
CT: control target
= control target key end

     0   :  { %vm37_vm0 = vcmask 1046528   ;;  %vm85_vm1 = vcmask 1041408   ;;  %vm136_vm2 = vcmask 1042432   ;;  %v1039_v0 = vmov 0.0   ;;  %s1278_s3 = inlined_call_operand.vmem [shape: bf16[496,64], index: 3, kind: input, shape index: {}]   ;;  %s1279_s1 = inlined_call_operand.vmem [shape: f32[1,14], index: 1, kind: input, shape index: {}]   ;;  %s1280_s0 = inlined_call_operand.vmem [shape: f32[1,4], index: 0, kind: input, shape index: {}]   ;;  %s1281_s2 = inlined_call_operand.vmem [shape: f32[1,5], index: 2, kind: input, shape index: {}]   ;;  %s1282_s4 = inlined_call_operand.vmem [shape: f32[8,64], index: 4, kind: input, shape index: {}]   ;;  %s1283_s5 = inlined_call_operand.vmem [shape: f32[1,64], index: 5, kind: output, shape index: {}]  }
   0x1   :  { %885 = vmatprep.subr.bf16.mxu0 %v1039_v0  ;;  %v990_v1 = vld [vmem:[%s1278_s3 + $0x8] sm:$0x7f]   ;;  %891 = vmatprep.subr.bf16.mxu1 %v1039_v0  ;;  %v22_v2 = vld [vmem:[%s1278_s3] sm:$0x3]  ;;  %v130_v3 = vld [vmem:[%s1278_s3 + $0x10] sm:$0x7] }
   0x2   :  { %v39_v4 = vsel %vm37_vm0, %v990_v1, 0  ;;  %v87_v5 = vsel %vm85_vm1, %v22_v2, 0  ;;  %v1040_v6 = vmov 65535   ;;  %vm1041_vm3 = vmmov 0   ;;  %v24_v8 = vld [vmem:[%s1279_s1] sm:$0x1] }
   0x3   :  { %v137_v7 = vsel %vm85_vm1, 4294967295, %v1040_v6  ;;  %887 = vmatprep.mubr.msk.bf16.mxu0 %vm1041_vm3, %v1039_v0  ;;  %893 = vmatprep.mubr.msk.bf16.mxu1 %vm1041_vm3, %v1039_v0  ;;  %v27_v10 = vpack.c.bf16 %v24_v8, %v24_v8  ;;  %vm33_vm4 = vcmask 113664   ;;  %v21_v11 = vld [vmem:[%s1280_s0] sm:$0x1]  ;;  %vm81_vm5 = vcmask 31744   ;;  %v991_v16 = vld [vmem:[%s1278_s3 + $0x18] sm:$0xff]  }
   0x4   :  { %886 = vmatpush3.bf16.msra.mxu0 %v39_v4  ;;  %892 = vmatpush3.bf16.msra.mxu1 %v87_v5  ;;  %v138_v9 = vsel %vm136_vm2, %v137_v7, 0  ;;  %v23_v13 = vpack.c.bf16 %v21_v11, %v21_v11  ;;  %vm132_vm6 = vcmask 39936   ;;  %v129_v14 = vld [vmem:[%s1281_s2] sm:$0x1]  ;;  %v993_v18 = vld [vmem:[%s1278_s3 + $0x28] sm:$0xff]   ;;  %v994_v19 = vld [vmem:[%s1278_s3 + $0x30] sm:$0xff]  }
   0x5   :  { %v140_v12 = vand.u32 %v138_v9, %v130_v3  ;;  %897 = vmatprep.subr.bf16.mxu0 %v1039_v0  ;;  %903 = vmatprep.subr.bf16.mxu1 %v1039_v0  ;;  %v131_v15 = vpack.c.bf16 %v129_v14, %v129_v14  ;;  %v992_v17 = vld [vmem:[%s1278_s3 + $0x20] sm:$0xff]   ;;  %v995_v20 = vld [vmem:[%s1278_s3 + $0x38] sm:$0xff]   ;;  %vm227_vm7 = vcmask 523264   ;;  %v997_v39 = vld [vmem:[%s1278_s3 + $0x48] sm:$0xff]   ;;  %vm768_vm14 = vcmask 516096  }
   0x6   :  { %v996_v21 = vld [vmem:[%s1278_s3 + $0x40] sm:$0xff]   ;;  %v998_v40 = vld [vmem:[%s1278_s3 + $0x50] sm:$0xff]   ;;  %v999_v50 = vld [vmem:[%s1278_s3 + $0x58] sm:$0xff]  }
   0x7   :  { %888 = vmatmul.mubr.msk.bf16.vlgmr.msra.gmra.mrb[0].mxu0 %vm33_vm4, %v27_v10  ;;  %894 = vmatmul.mubr.msk.bf16.vlgmr.msra.gmra.mrb[0].mxu1 %vm81_vm5, %v23_v13  ;;  %v183_v32 = vld [vmem:[%s1282_s4] sm:$0x1]  ;;  %v202_v41 = vld [vmem:[%s1282_s4 + $0x1] sm:$0x1]  ;;  %v1001_v52 = vld [vmem:[%s1278_s3 + $0x68] sm:$0xff]  }
   0x8   :  { %898 = vmatpush3.bf16.msra.mxu0 %v140_v12  ;;  %899 = vmatprep.mubr.msk.bf16.mxu0 %vm1041_vm3, %v1039_v0  ;;  %v1000_v51 = vld [vmem:[%s1278_s3 + $0x60] sm:$0xff]   ;;  %v1002_v53 = vld [vmem:[%s1278_s3 + $0x70] sm:$0xff]   ;;  %v1003_v54 = vld [vmem:[%s1278_s3 + $0x78] sm:$0xff]  }
   0x9   :  { %911 = vmatprep.mubr.msk.bf16.mxu1 %vm1041_vm3, %v1039_v0  ;;  %915 = vmatprep.subr.bf16.mxu0 %v1039_v0  ;;  %v1004_v55 = vld [vmem:[%s1278_s3 + $0x80] sm:$0xff]   ;;  %v1005_v9 = vld [vmem:[%s1278_s3 + $0x88] sm:$0xff]   ;;  %v1006_v10 = vld [vmem:[%s1278_s3 + $0x90] sm:$0xff]  }
   0xa   :  { %904 = vmatpush3.bf16.msra.mxu1 %v991_v16  ;;  %v275_v56 = vld [vmem:[%s1282_s4 + $0x4] sm:$0x1]  ;;  %v369_v11 = vld [vmem:[%s1282_s4 + $0x2] sm:$0x1] }
   0xb   :  { %905 = vmatprep.subr.bf16.mxu1 %v1039_v0 }
   0xe   :  { %906 = vmatpush3.bf16.msra.mxu1 %v992_v17 }
   0xf   :  { %900 = vmatmul.mubr.msk.bf16.vlgmr.msra.gmra.mrb[4].mxu0 %vm132_vm6, %v131_v15  ;;  %907 = vmatprep.subr.bf16.mxu1 %v1039_v0 }
  0x10   :  { %923 = vmatprep.mubr.msk.bf16.mxu0 %vm1041_vm3, %v1039_v0  ;;  %916 = vmatpush3.bf16.msra.mxu0 %v995_v20  ;;  %v1007_v20 = vld [vmem:[%s1278_s3 + $0x98] sm:$0xff]  }
  0x11   :  { %917 = vmatprep.subr.bf16.mxu0 %v1039_v0 }
  0x12   :  { %908 = vmatpush3.bf16.msra.mxu1 %v993_v18 }
  0x13   :  { %909 = vmatprep.subr.bf16.mxu1 %v1039_v0 }
  0x14   :  { %918 = vmatpush3.bf16.msra.mxu0 %v996_v21  ;;  %v1008_v21 = vld [vmem:[%s1278_s3 + $0xa0] sm:$0xff]  }
  0x15   :  { %919 = vmatprep.subr.bf16.mxu0 %v1039_v0 }
  0x16   :  { %910 = vmatpush3.bf16.msra.mxu1 %v994_v19 }
  0x17   :  { %927 = vmatprep.subr.bf16.mxu1 %v1039_v0 }
  0x18   :  { %920 = vmatpush3.bf16.msra.mxu0 %v997_v39 }
  0x19   :  { %921 = vmatprep.subr.bf16.mxu0 %v1039_v0 }
  0x1c   :  { %922 = vmatpush3.bf16.msra.mxu0 %v998_v40 }
  0x1d   :  { %939 = vmatprep.subr.bf16.mxu0 %v1039_v0 }
  0xda   :  { %v75_v22 = vpop.f32.mrb[0].mxu0  ;;  %v123_v23 = vpop.f32.mrb[0].mxu1 }
  0xdb   :  { %v889_v24 = vpop.f32.mrb[1].mxu0  ;;  %v124_v25 = vadd.f32 %v123_v23, %v75_v22  ;;  %v895_v26 = vpop.f32.mrb[1].mxu1  ;;  %v1009_v22 = vld [vmem:[%s1278_s3 + $0xa8] sm:$0xff]   ;;  %v1010_v23 = vld [vmem:[%s1278_s3 + $0xb0] sm:$0xff]  }
  0xdc   :  { %v78_v27 = vpop.f32.mrb[2].mxu0  ;;  %v126_v28 = vpop.f32.mrb[2].mxu1  ;;  %v1011_v24 = vld [vmem:[%s1278_s3 + $0xb8] sm:$0xff]   ;;  %v441_v26 = vld [vmem:[%s1282_s4 + $0x5] sm:$0x1] }
  0xdd   :  { %v890_v29 = vpop.f32.mrb[3].mxu0  ;;  %v896_v30 = vpop.f32.mrb[3].mxu1 }
  0xe2   :  { %v176_v31 = vpop.f32.mrb[4].mxu0 }
  0xe3   :  { %v182_v33 = vadd.f32 %v176_v31, %v124_v25  ;;  %v901_v34 = vpop.f32.mrb[5].mxu0  ;;  %v1012_v25 = vld [vmem:[%s1278_s3 + $0xc0] sm:$0xff]  }
  0xe4   :  { %v179_v35 = vpop.f32.mrb[6].mxu0 }
  0xe5   :  { %v184_v36 = vadd.f32 %v183_v32, %v182_v33  ;;  %v902_v37 = vpop.f32.mrb[7].mxu0 }
  0xe7   :  { %v201_v38 = vpack.c.bf16 %v184_v36, %v184_v36 }
  0xe9   :  { %912 = vmatmul.mubr.msk.bf16.vlgmr.msra.gmra.mrb[4].mxu1 %vm227_vm7, %v201_v38 }
  0xea   :  { %935 = vmatprep.mubr.msk.bf16.mxu1 %vm1041_vm3, %v1039_v0  ;;  %928 = vmatpush3.bf16.msra.mxu1 %v999_v50 }
  0xeb   :  { %929 = vmatprep.subr.bf16.mxu1 %v1039_v0 }
  0xee   :  { %930 = vmatpush3.bf16.msra.mxu1 %v1000_v51 }
  0xef   :  { %931 = vmatprep.subr.bf16.mxu1 %v1039_v0 }
  0xf2   :  { %932 = vmatpush3.bf16.msra.mxu1 %v1001_v52 }
  0xf3   :  { %933 = vmatprep.subr.bf16.mxu1 %v1039_v0 }
  0xf6   :  { %934 = vmatpush3.bf16.msra.mxu1 %v1002_v53  ;;  %v1015_v53 = vld [vmem:[%s1278_s3 + $0xd8] sm:$0xff]  }
  0xf7   :  { %951 = vmatprep.subr.bf16.mxu1 %v1039_v0 }
 0x1bc   :  { %v265_v42 = vpop.f32.mrb[4].mxu1 }
 0x1bd   :  { %v266_v43 = vadd.f32 %v265_v42, %v202_v41  ;;  %v913_v44 = vpop.f32.mrb[5].mxu1  ;;  %v1013_v42 = vld [vmem:[%s1278_s3 + $0xc8] sm:$0xff]  }
 0x1be   :  { %v268_v45 = vpop.f32.mrb[6].mxu1  ;;  %v535_v44 = vld [vmem:[%s1282_s4 + $0x3] sm:$0x1] }
 0x1bf   :  { %vm271_vm8 = vcmp.ge.f32.partialorder %v266_v43, 0.0  ;;  %v272_v46 = vmul.f32 0.01, %v266_v43  ;;  %v914_v47 = vpop.f32.mrb[7].mxu1 }
 0x1c1   :  { %v273_v48 = vsel %vm271_vm8, %v266_v43, %v272_v46  ;;  %v1014_v43 = vld [vmem:[%s1278_s3 + $0xd0] sm:$0xff]  }
 0x1c2   :  { %v274_v49 = vpack.c.bf16 %v273_v48, %v273_v48 }
 0x1c4   :  { %924 = vmatmul.mubr.msk.bf16.vlgmr.msra.gmra.mrb[8].mxu0 %vm227_vm7, %v274_v49 }
 0x1c5   :  { %947 = vmatprep.mubr.msk.bf16.mxu0 %vm1041_vm3, %v1039_v0  ;;  %940 = vmatpush3.bf16.msra.mxu0 %v1003_v54  ;;  %v1016_v54 = vld [vmem:[%s1278_s3 + $0xe0] sm:$0xff]  }
 0x1c6   :  { %941 = vmatprep.subr.bf16.mxu0 %v1039_v0 }
 0x1c9   :  { %942 = vmatpush3.bf16.msra.mxu0 %v1004_v55  ;;  %v1017_v55 = vld [vmem:[%s1278_s3 + $0xe8] sm:$0xff]  }
 0x1ca   :  { %943 = vmatprep.subr.bf16.mxu0 %v1039_v0 }
 0x1cd   :  { %944 = vmatpush3.bf16.msra.mxu0 %v1005_v9  ;;  %v761_v9 = vlaneseq }
 0x1ce   :  { %945 = vmatprep.subr.bf16.mxu0 %v1039_v0 }
 0x1d1   :  { %946 = vmatpush3.bf16.msra.mxu0 %v1006_v10  ;;  %v762_v10 = vand.u32 127, %v761_v9 }
 0x1d2   :  { %963 = vmatprep.subr.bf16.mxu0 %v1039_v0 }
 0x1d3   :  { %vm764_vm11 = vcmp.ge.s32.totalorder %v762_v10, 2  ;;  %vm765_vm12 = vcmp.lt.s32.totalorder %v762_v10, 23  ;;  %vm763_vm15 = vcmp.lt.s32.totalorder %v762_v10, 2 }
 0x1d4   :  { %vm1257_vm13 = vmand %vm764_vm11, %vm765_vm12 }
 0x297   :  { %v337_v57 = vpop.f32.mrb[8].mxu0 }
 0x298   :  { %v338_v58 = vadd.f32 %v337_v57, %v275_v56  ;;  %v925_v59 = vpop.f32.mrb[9].mxu0  ;;  %v1018_v56 = vld [vmem:[%s1278_s3 + $0xf0] sm:$0xff]   ;;  %v607_v57 = vld [vmem:[%s1282_s4 + $0x6] sm:$0x1] }
 0x299   :  { %v340_v60 = vpop.f32.mrb[10].mxu0 }
 0x29a   :  { %v343_v61 = vadd.f32 %v338_v58, %v184_v36  ;;  %v926_v62 = vpop.f32.mrb[11].mxu0 }
 0x29c   :  { %v344_v63 = vmin.f32 %v343_v61, 30.0 }
 0x29e   :  { %v345_v1 = vmul.f32 1.442695, %v344_v63 }
 0x2a0   :  { %1019 = vpow2.f32 %v345_v1 }
 0x2aa   :  { %v1020_v2 = vpop.eup %1019 }
 0x2ab   :  { %v347_v3 = vadd.f32 2.0, %v1020_v2 }
 0x2ad   :  { %v348_v4 = vmul.f32 %v1020_v2, %v347_v3 }
 0x2af   :  { %v349_v5 = vadd.f32 2.0, %v348_v4 }
 0x2b1   :  { %1021 = vrcp.f32 %v349_v5 }
 0x2bb   :  { %v1022_v6 = vpop.eup %1021 }
 0x2bc   :  { %v351_v7 = vmul.f32 %v1022_v6, %v348_v4 }
 0x2be   :  { %v368_v8 = vpack.c.bf16 %v351_v7, %v351_v7 }
 0x2c0   :  { %936 = vmatmul.mubr.msk.bf16.vlgmr.msra.gmra.mrb[8].mxu1 %vm227_vm7, %v368_v8 }
 0x2c1   :  { %959 = vmatprep.mubr.msk.bf16.mxu1 %vm1041_vm3, %v1039_v0  ;;  %952 = vmatpush3.bf16.msra.mxu1 %v1007_v20 }
 0x2c2   :  { %953 = vmatprep.subr.bf16.mxu1 %v1039_v0 }
 0x2c5   :  { %954 = vmatpush3.bf16.msra.mxu1 %v1008_v21 }
 0x2c6   :  { %955 = vmatprep.subr.bf16.mxu1 %v1039_v0 }
 0x2c9   :  { %956 = vmatpush3.bf16.msra.mxu1 %v1009_v22 }
 0x2ca   :  { %957 = vmatprep.subr.bf16.mxu1 %v1039_v0 }
 0x2cd   :  { %958 = vmatpush3.bf16.msra.mxu1 %v1010_v23 }
 0x2ce   :  { %975 = vmatprep.subr.bf16.mxu1 %v1039_v0 }
 0x393   :  { %v431_v12 = vpop.f32.mrb[8].mxu1 }
 0x394   :  { %v432_v13 = vadd.f32 %v431_v12, %v369_v11  ;;  %v937_v14 = vpop.f32.mrb[9].mxu1  ;;  %v693_v11 = vld [vmem:[%s1282_s4 + $0x7] sm:$0x1] }
 0x395   :  { %v434_v15 = vpop.f32.mrb[10].mxu1 }
 0x396   :  { %vm437_vm9 = vcmp.ge.f32.partialorder %v432_v13, 0.0  ;;  %v438_v16 = vmul.f32 0.01, %v432_v13  ;;  %v938_v17 = vpop.f32.mrb[11].mxu1 }
 0x398   :  { %v439_v18 = vsel %vm437_vm9, %v432_v13, %v438_v16 }
 0x399   :  { %v440_v19 = vpack.c.bf16 %v439_v18, %v439_v18 }
 0x39b   :  { %948 = vmatmul.mubr.msk.bf16.vlgmr.msra.gmra.mrb[12].mxu0 %vm227_vm7, %v440_v19 }
 0x39c   :  { %971 = vmatprep.mubr.msk.bf16.mxu0 %vm1041_vm3, %v1039_v0  ;;  %964 = vmatpush3.bf16.msra.mxu0 %v1011_v24 }
 0x39d   :  { %965 = vmatprep.subr.bf16.mxu0 %v1039_v0 }
 0x3a0   :  { %966 = vmatpush3.bf16.msra.mxu0 %v1012_v25 }
 0x3a1   :  { %967 = vmatprep.subr.bf16.mxu0 %v1039_v0 }
 0x3a4   :  { %968 = vmatpush3.bf16.msra.mxu0 %v1013_v42 }
 0x3a5   :  { %969 = vmatprep.subr.bf16.mxu0 %v1039_v0 }
 0x3a8   :  { %970 = vmatpush3.bf16.msra.mxu0 %v1014_v43 }
 0x46e   :  { %v503_v27 = vpop.f32.mrb[12].mxu0 }
 0x46f   :  { %v504_v28 = vadd.f32 %v503_v27, %v441_v26  ;;  %v949_v29 = vpop.f32.mrb[13].mxu0 }
 0x470   :  { %v506_v30 = vpop.f32.mrb[14].mxu0 }
 0x471   :  { %v509_v31 = vadd.f32 %v504_v28, %v351_v7  ;;  %v950_v32 = vpop.f32.mrb[15].mxu0 }
 0x473   :  { %v510_v33 = vmin.f32 %v509_v31, 30.0 }
 0x475   :  { %v511_v34 = vmul.f32 1.442695, %v510_v33 }
 0x477   :  { %1023 = vpow2.f32 %v511_v34 }
 0x481   :  { %v1024_v35 = vpop.eup %1023 }
 0x482   :  { %v513_v36 = vadd.f32 2.0, %v1024_v35 }
 0x484   :  { %v514_v37 = vmul.f32 %v1024_v35, %v513_v36 }
 0x486   :  { %v515_v38 = vadd.f32 2.0, %v514_v37 }
 0x488   :  { %1025 = vrcp.f32 %v515_v38 }
 0x492   :  { %v1026_v39 = vpop.eup %1025 }
 0x493   :  { %v517_v40 = vmul.f32 %v1026_v39, %v514_v37 }
 0x495   :  { %v534_v41 = vpack.c.bf16 %v517_v40, %v517_v40 }
 0x497   :  { %960 = vmatmul.mubr.msk.bf16.vlgmr.msra.gmra.mrb[12].mxu1 %vm227_vm7, %v534_v41 }
 0x498   :  { %983 = vmatprep.mubr.msk.bf16.mxu1 %vm1041_vm3, %v1039_v0  ;;  %976 = vmatpush3.bf16.msra.mxu1 %v1015_v53 }
 0x499   :  { %977 = vmatprep.subr.bf16.mxu1 %v1039_v0 }
 0x49c   :  { %978 = vmatpush3.bf16.msra.mxu1 %v1016_v54 }
 0x49d   :  { %979 = vmatprep.subr.bf16.mxu1 %v1039_v0 }
 0x4a0   :  { %980 = vmatpush3.bf16.msra.mxu1 %v1017_v55 }
 0x4a1   :  { %981 = vmatprep.subr.bf16.mxu1 %v1039_v0 }
 0x4a4   :  { %982 = vmatpush3.bf16.msra.mxu1 %v1018_v56 }
 0x56a   :  { %v597_v45 = vpop.f32.mrb[12].mxu1 }
 0x56b   :  { %v598_v46 = vadd.f32 %v597_v45, %v535_v44  ;;  %v961_v47 = vpop.f32.mrb[13].mxu1 }
 0x56c   :  { %v600_v48 = vpop.f32.mrb[14].mxu1 }
 0x56d   :  { %vm603_vm10 = vcmp.ge.f32.partialorder %v598_v46, 0.0  ;;  %v604_v49 = vmul.f32 0.01, %v598_v46  ;;  %v962_v50 = vpop.f32.mrb[15].mxu1 }
 0x56f   :  { %v605_v51 = vsel %vm603_vm10, %v598_v46, %v604_v49 }
 0x570   :  { %v606_v52 = vpack.c.bf16 %v605_v51, %v605_v51 }
 0x572   :  { %972 = vmatmul.mubr.msk.bf16.vlgmr.msra.gmra.mrb[16].mxu0 %vm227_vm7, %v606_v52 }
 0x645   :  { %v669_v58 = vpop.f32.mrb[16].mxu0 }
 0x646   :  { %v670_v59 = vadd.f32 %v669_v58, %v607_v57  ;;  %v973_v60 = vpop.f32.mrb[17].mxu0 }
 0x647   :  { %v672_v61 = vpop.f32.mrb[18].mxu0 }
 0x648   :  { %v675_v62 = vadd.f32 %v670_v59, %v517_v40  ;;  %v974_v63 = vpop.f32.mrb[19].mxu0 }
 0x64a   :  { %v676_v1 = vmin.f32 %v675_v62, 30.0 }
 0x64c   :  { %v677_v2 = vmul.f32 1.442695, %v676_v1 }
 0x64e   :  { %1027 = vpow2.f32 %v677_v2 }
 0x658   :  { %v1028_v3 = vpop.eup %1027 }
 0x659   :  { %v679_v4 = vadd.f32 2.0, %v1028_v3 }
 0x65b   :  { %v680_v5 = vmul.f32 %v1028_v3, %v679_v4 }
 0x65d   :  { %v681_v6 = vadd.f32 2.0, %v680_v5 }
 0x65f   :  { %1029 = vrcp.f32 %v681_v6 }
 0x669   :  { %v1030_v0 = vpop.eup %1029 }
 0x66a   :  { %v683_v7 = vmul.f32 %v1030_v0, %v680_v5 }
 0x66c   :  { %v692_v8 = vpack.c.bf16 %v683_v7, %v683_v7 }
 0x66e   :  { %984 = vmatmul.mubr.msk.bf16.vlgmr.msra.gmra.mrb[16].mxu1 %vm227_vm7, %v692_v8 }
 0x741   :  { %v755_v12 = vpop.f32.mrb[16].mxu1 }
 0x742   :  { %v756_v14 = vadd.f32 %v755_v12, %v693_v11  ;;  %v985_v15 = vpop.f32.mrb[17].mxu1 }
 0x743   :  { %v758_v16 = vpop.f32.mrb[18].mxu1 }
 0x744   :  { %v986_v17 = vpop.f32.mrb[19].mxu1  ;;  %v783_v18 = vsel %vm1257_vm13, %v756_v14, -1e+30  ;;  %v767_v20 = vsel %vm763_vm15, %v756_v14, -1e+30 }
 0x745   :  { %v784_v19 = vsel %vm768_vm14, %v783_v18, -inf  ;;  %v769_v21 = vsel %vm768_vm14, %v767_v20, -inf }
 0x746   :  { %785 = vmax.xlane.f32.xlu0 %v784_v19 }
 0x74a   :  { %770 = vmax.xlane.f32.xlu0 %v769_v21 }
 0x7d3   :  { %v786_v22 = vpop.xlane.xlu0 %785 }
 0x7d4   :  { %v787_v23 = vsub.f32 %v783_v18, %v786_v22 }
 0x7d6   :  { %v788_v24 = vmul.f32 1.442695, %v787_v23 }
 0x7d7   :  { %v771_v25 = vpop.xlane.xlu0 %770 }
 0x7d8   :  { %1031 = vpow2.f32 %v788_v24  ;;  %v772_v26 = vsub.f32 %v767_v20, %v771_v25 }
 0x7da   :  { %v773_v27 = vmul.f32 1.442695, %v772_v26 }
 0x7dc   :  { %1033 = vpow2.f32 %v773_v27 }
 0x7e2   :  { %v1032_v28 = vpop.eup %1031 }
 0x7e3   :  { %v790_v29 = vsel %vm1257_vm13, %v1032_v28, 0.0 }
 0x7e4   :  { %v791_v30 = vsel %vm768_vm14, %v790_v29, 0.0 }
 0x7e5   :  { %792 = vadd.xlane.f32.xlu1 %v791_v30 }
 0x7e6   :  { %v1034_v31 = vpop.eup %1033 }
 0x7e7   :  { %v775_v32 = vsel %vm763_vm15, %v1034_v31, 0.0 }
 0x7e8   :  { %v776_v33 = vsel %vm768_vm14, %v775_v32, 0.0 }
 0x7e9   :  { %777 = vadd.xlane.f32.xlu1 %v776_v33 }
 0x872   :  { %v793_v34 = vpop.xlane.xlu1 %792 }
 0x873   :  { %1035 = vrcp.f32 %v793_v34 }
 0x876   :  { %v778_v35 = vpop.xlane.xlu1 %777 }
 0x877   :  { %1037 = vrcp.f32 %v778_v35 }
 0x87d   :  { %v1036_v36 = vpop.eup %1035 }
 0x87e   :  { %v795_v37 = vmul.f32 %v1036_v36, %v790_v29 }
 0x880   :  { %v796_v38 = vmax.f32 %v795_v37, 0.01 }
 0x881   :  { %v1038_v39 = vpop.eup %1037 }
 0x882   :  { %v780_v40 = vmul.f32 %v1038_v39, %v775_v32  ;;  %v797_v41 = vmin.f32 %v796_v38, 0.98 }
 0x884   :  { %v781_v42 = vmax.f32 %v780_v40, 0.01  ;;  %v798_v44 = vsel %vm1257_vm13, %v797_v41, 0.0 }
 0x886   :  { %v782_v43 = vmin.f32 %v781_v42, 0.999 }
 0x888   :  { %v799_v45 = vsel %vm763_vm15, %v782_v43, %v798_v44 }
 0x889   :  { %800 = vst.msk [vmem:[%s1283_s5] sm:$0x1] %vm768_vm14, %v799_v45 }

</bundles_post_ra>
